<compile_context>
chip_gen: v6e
topology: v6e:2x2x1
jax: 0.10.0
libtpu: 0.0.40
codegen_flags: <defaults>
</compile_context>

<pallas_src>
import numpy as np
import jax
import jax.numpy as jnp
from jax.experimental import pallas as pl
from jax.experimental.pallas import tpu as pltpu


# ---------------------------------------------------------------------------
# Host-side helper matrices (built ONCE, reused across forwards).
# ---------------------------------------------------------------------------
def adaptive_pool_matrix(out_size: int, in_size: int) -> np.ndarray:
    """Row i averages input indices [floor(i*in/out), ceil((i+1)*in/out))."""
    m = np.zeros((out_size, in_size), np.float32)
    for i in range(out_size):
        s = (i * in_size) // out_size
        e = -(-((i + 1) * in_size) // out_size)  # ceil division
        m[i, s:e] = 1.0 / float(e - s)
    return m


def bilinear_matrix_align_corners(out_size: int, in_size: int) -> np.ndarray:
    """Row o contains the bilinear weights (align_corners=True)."""
    m = np.zeros((out_size, in_size), np.float32)
    if in_size == 1:
        m[:, 0] = 1.0
        return m
    if out_size == 1:
        m[0, 0] = 1.0
        return m
    scale = (in_size - 1) / (out_size - 1)
    for o in range(out_size):
        c = o * scale
        i0 = min(int(np.floor(c)), in_size - 1)
        i1 = min(i0 + 1, in_size - 1)
        f = c - i0
        m[o, i0] += 1.0 - f
        m[o, i1] += f
    return m


def build_ppm_tables(bins, H, W):
    """Stacked pool (HW, sum b^2) and upsample (sum b^2, HW) operators, bf16."""
    pool_cols, up_rows = [], []
    for b in bins:
        ph = adaptive_pool_matrix(b, H)
        pw = adaptive_pool_matrix(b, W)
        pool_cols.append(np.kron(ph, pw).T)                    # (HW, b^2)
        uh = bilinear_matrix_align_corners(H, b)
        uw = bilinear_matrix_align_corners(W, b)
        up_rows.append(np.kron(uh, uw).T)                      # (b^2, HW)
    pool_t = jnp.asarray(np.concatenate(pool_cols, axis=1), jnp.bfloat16)  # (HW, SB2)
    up_t = jnp.asarray(np.concatenate(up_rows, axis=0), jnp.bfloat16)      # (SB2, HW)
    return pool_t, up_t


def build_block_diag_mask(bins, R):
    """(SumR, sum b^2) block-diagonal 0/1 mask pairing bin rows with bin cols."""
    sb2 = sum(b * b for b in bins)
    m = np.zeros((R * len(bins), sb2), np.float32)
    off = 0
    for i, b in enumerate(bins):
        m[i * R:(i + 1) * R, off:off + b * b] = 1.0
        off += b * b
    return jnp.asarray(m)


def fold_ppm_params(params):
    """Stack per-bin conv weights (bf16) and eval-mode BN scale/shift (f32)."""
    ws, scales, shifts = [], [], []
    for p in params:
        scale = p["gamma"] / jnp.sqrt(p["running_var"] + 1e-5)
        shift = p["beta"] - p["running_mean"] * scale
        ws.append(p["conv_w"])
        scales.append(scale)
        shifts.append(shift)
    w = jnp.concatenate(ws, axis=0).astype(jnp.bfloat16)       # (SumR, C)
    scale = jnp.concatenate(scales, axis=0)[:, None]           # (SumR, 1) f32
    shift = jnp.concatenate(shifts, axis=0)[:, None]           # (SumR, 1) f32
    return w, scale, shift


# ---------------------------------------------------------------------------
# Stage A: adaptive pool + 1x1 conv + BN + ReLU (all bins fused, per batch).
# ---------------------------------------------------------------------------
def pool_conv_kernel(x_ref, p_ref, w_ref, scale_ref, shift_ref, mask_ref, z_ref):
    x = x_ref[0].astype(jnp.bfloat16)                              # (C, HW)
    # Adaptive average pool for ALL bins in one MXU matmul, f32 accumulation.
    pooled = jnp.dot(x, p_ref[...],
                     preferred_element_type=jnp.float32)           # (C, SB2)
    # 1x1 conv for ALL bins (only the block-diagonal part is kept below).
    y = jnp.dot(w_ref[...], pooled.astype(jnp.bfloat16),
                preferred_element_type=jnp.float32)                # (SumR, SB2)
    # BatchNorm (eval mode) applied in f32 on the VPU, then ReLU + bin mask.
    y = y * scale_ref[...] + shift_ref[...]
    z = jnp.maximum(y, 0.0) * mask_ref[...]
    z_ref[0] = z.astype(jnp.bfloat16)


# ---------------------------------------------------------------------------
# Stage B: bilinear upsample (align_corners=True) for all bins, HW-tiled.
# ---------------------------------------------------------------------------
def upsample_kernel(z_ref, u_ref, o_ref):
    o_ref[0] = jnp.dot(z_ref[0], u_ref[...],
                       preferred_element_type=jnp.float32)         # (SumR, hw_tile)


def ppm_forward(x, w, scale, shift, pool_t, up_t, mask):
    """x: (N, C, H, W) f32.  Returns (N, C + SumR, H, W) f32."""
    N, C, H, W = x.shape
    HW = H * W
    SumR = w.shape[0]
    SB2 = pool_t.shape[1]
    x_flat = x.reshape(N, C, HW)

    # --- Stage A: (N, SumR, SB2) bf16, one grid step per batch element. -----
    z = pl.pallas_call(
        pool_conv_kernel,
        out_shape=jax.ShapeDtypeStruct((N, SumR, SB2), jnp.bfloat16),
        grid=(N,),
        in_specs=[
            pl.BlockSpec((1, C, HW), lambda n: (n, 0, 0)),      # x (per batch elem)
            pl.BlockSpec((HW, SB2), lambda n: (0, 0)),          # stacked pool operator
            pl.BlockSpec((SumR, C), lambda n: (0, 0)),          # stacked conv weights
            pl.BlockSpec((SumR, 1), lambda n: (0, 0)),          # BN scale (f32)
            pl.BlockSpec((SumR, 1), lambda n: (0, 0)),          # BN shift (f32)
            pl.BlockSpec((SumR, SB2), lambda n: (0, 0)),        # block-diagonal mask
        ],
        out_specs=pl.BlockSpec((1, SumR, SB2), lambda n: (n, 0, 0)),
        compiler_params=pltpu.CompilerParams(
            dimension_semantics=("parallel",)),
        cost_estimate=pl.CostEstimate(
            flops=2 * N * (C * HW * SB2 + SumR * C * SB2),
            transcendentals=0,
            bytes_accessed=N * (C * HW * 4 + SumR * SB2 * 2)
            + HW * SB2 * 2 + SumR * C * 2 + SumR * (4 + 4) + SumR * SB2 * 4),
    )(x_flat, pool_t, w, scale, shift, mask)

    # --- Stage B: upsample, lane-dense 128-wide output tiles, 2 parallel axes.
    hw_tile = 128 if HW % 128 == 0 else HW
    branches = pl.pallas_call(
        upsample_kernel,
        out_shape=jax.ShapeDtypeStruct((N, SumR, HW), jnp.float32),
        grid=(N, HW // hw_tile),
        in_specs=[
            pl.BlockSpec((1, SumR, SB2), lambda n, t: (n, 0, 0)),
            pl.BlockSpec((SB2, hw_tile), lambda n, t: (0, t)),
        ],
        out_specs=pl.BlockSpec((1, SumR, hw_tile), lambda n, t: (n, 0, t)),
        compiler_params=pltpu.CompilerParams(
            dimension_semantics=("parallel", "parallel")),
        cost_estimate=pl.CostEstimate(
            flops=2 * N * SumR * SB2 * HW,
            transcendentals=0,
            bytes_accessed=N * (SumR * SB2 * 2 + SumR * HW * 4) + SB2 * HW * 2),
    )(z, up_t)

    # x passthrough stays a plain XLA copy outside the compute kernels.
    out = jnp.concatenate([x_flat, branches], axis=1)
    return out.reshape(N, C + SumR, H, W)


ppm_forward_jit = jax.jit(ppm_forward)


# ---------------------------------------------------------------------------
# Pure-JAX f32 reference in the ORIGINAL op order (pool -> conv -> BN -> ReLU
# -> upsample -> concat).
# ---------------------------------------------------------------------------
def ppm_reference(x, params, bins):
    N, C, H, W = x.shape
    x_flat = x.reshape(N, C, H * W)
    outs = [x]
    for bi, b in enumerate(bins):
        p = params[bi]
        scale = p["gamma"] / jnp.sqrt(p["running_var"] + 1e-5)
        shift = p["beta"] - p["running_mean"] * scale
        pool_t = jnp.asarray(np.kron(adaptive_pool_matrix(b, H),
                                     adaptive_pool_matrix(b, W)).T)
        up_t = jnp.asarray(np.kron(bilinear_matrix_align_corners(H, b),
                                   bilinear_matrix_align_corners(W, b)).T)
        pooled = jnp.einsum("ncp,pq->ncq", x_flat, pool_t)
        y = jnp.einsum("rc,ncq->nrq", p["conv_w"], pooled)
        y = y * scale[None, :, None] + shift[None, :, None]
        z = jnp.maximum(y, 0.0)
        out = jnp.einsum("nrq,qp->nrp", z, up_t)
        outs.append(out.reshape(N, -1, H, W))
    return jnp.concatenate(outs, axis=1)


if __name__ == "__main__":
    # Small shapes consistent with the module: in_dim=8, bins=(1,2,3,6),
    # reduction_dim = in_dim // len(bins) = 2 (PSPNet convention).
    N, C, H, W = 2, 8, 16, 16
    bins = (1, 2, 3, 6)
    R = C // len(bins)

    key = jax.random.PRNGKey(0)
    key, kx = jax.random.split(key)
    x = jax.random.normal(kx, (N, C, H, W), dtype=jnp.float32)

    # Deterministic per-branch parameters (eval-mode BN statistics).
    params = []
    for _ in bins:
        key, kw, kg, kb = jax.random.split(key, 4)
        params.append({
            "conv_w": jax.random.normal(kw, (R, C), dtype=jnp.float32) * 0.1,
            "gamma": 1.0 + 0.1 * jax.random.normal(kg, (R,), dtype=jnp.float32),
            "beta": 0.1 * jax.random.normal(kb, (R,), dtype=jnp.float32),
            "running_mean": jnp.zeros((R,), dtype=jnp.float32),
            "running_var": jnp.ones((R,), dtype=jnp.float32),
        })

    # Built once and reused across forwards (no per-call host-side numpy).
    pool_t, up_t = build_ppm_tables(bins, H, W)
    mask = build_block_diag_mask(bins, R)
    w_stk, scale_stk, shift_stk = fold_ppm_params(params)

    out = jax.block_until_ready(
        ppm_forward_jit(x, w_stk, scale_stk, shift_stk, pool_t, up_t, mask))
    ref = jax.block_until_ready(ppm_reference(x, params, bins))

    assert out.shape == (N, C + len(bins) * R, H, W), out.shape
    # bf16 MXU operands vs f32 reference -> relaxed tolerance.
    max_err = float(jnp.max(jnp.abs(out - ref)))
    assert jnp.allclose(out, ref, atol=3e-2, rtol=3e-2), f"mismatch, max|err|={max_err}"

    print("KERNEL_OK")
</pallas_src>

<mosaic_0001>
module attributes {stable_mosaic.version = 11 : i64} {
  func.func @pool_conv_kernel(%arg0: i32, %arg1: memref<1x8x256xf32, #tpu.memory_space<vmem>>, %arg2: memref<256x50xbf16, #tpu.memory_space<vmem>>, %arg3: memref<8x8xbf16, #tpu.memory_space<vmem>>, %arg4: memref<8x1xf32, #tpu.memory_space<vmem>>, %arg5: memref<8x1xf32, #tpu.memory_space<vmem>>, %arg6: memref<8x50xf32, #tpu.memory_space<vmem>>, %arg7: memref<1x8x50xbf16, #tpu.memory_space<vmem>>) attributes {dimension_semantics = [#tpu.dimension_semantics<parallel>], iteration_bounds = array<i64: 2>, scalar_prefetch = 0 : i64, scratch_operands = 0 : i64, tpu.core_type = #tpu.core_type<tc>, window_params = [{transform_indices = @transform_0, window_bounds = array<i64: 1, 8, 256>}, {pipeline_mode = #tpu.pipeline_mode<synchronous>, transform_indices = @transform_1, window_bounds = array<i64: 256, 50>}, {pipeline_mode = #tpu.pipeline_mode<synchronous>, transform_indices = @transform_2, window_bounds = array<i64: 8, 8>}, {pipeline_mode = #tpu.pipeline_mode<synchronous>, transform_indices = @transform_3, window_bounds = array<i64: 8, 1>}, {pipeline_mode = #tpu.pipeline_mode<synchronous>, transform_indices = @transform_4, window_bounds = array<i64: 8, 1>}, {pipeline_mode = #tpu.pipeline_mode<synchronous>, transform_indices = @transform_5, window_bounds = array<i64: 8, 50>}, {transform_indices = @transform_6, window_bounds = array<i64: 1, 8, 50>}]} {
    %c0 = arith.constant 0 : index
    %c0_0 = arith.constant 0 : index
    %c0_1 = arith.constant 0 : index
    %0 = vector.load %arg1[%c0, %c0_0, %c0_1] : memref<1x8x256xf32, #tpu.memory_space<vmem>>, vector<1x8x256xf32>
    %1 = vector.shape_cast %0 : vector<1x8x256xf32> to vector<8x256xf32>
    %2 = arith.truncf %1 : vector<8x256xf32> to vector<8x256xbf16>
    %c0_2 = arith.constant 0 : index
    %c0_3 = arith.constant 0 : index
    %3 = vector.load %arg2[%c0_2, %c0_3] : memref<256x50xbf16, #tpu.memory_space<vmem>>, vector<256x50xbf16>
    %cst = arith.constant dense<0.000000e+00> : vector<8x50xf32>
    %4 = tpu.matmul %2, %3, %cst {dimension_numbers = #tpu.dot_dimension_numbers<[1], [0], [0], [1], [0, 0, 1, 1], [], []>} : vector<8x256xbf16>, vector<256x50xbf16>, vector<8x50xf32> -> vector<8x50xf32>
    %c0_4 = arith.constant 0 : index
    %c0_5 = arith.constant 0 : index
    %5 = vector.load %arg3[%c0_4, %c0_5] : memref<8x8xbf16, #tpu.memory_space<vmem>>, vector<8x8xbf16>
    %6 = arith.truncf %4 : vector<8x50xf32> to vector<8x50xbf16>
    %cst_6 = arith.constant dense<0.000000e+00> : vector<8x50xf32>
    %7 = tpu.matmul %5, %6, %cst_6 {dimension_numbers = #tpu.dot_dimension_numbers<[1], [0], [0], [1], [0, 0, 1, 1], [], []>} : vector<8x8xbf16>, vector<8x50xbf16>, vector<8x50xf32> -> vector<8x50xf32>
    %c0_7 = arith.constant 0 : index
    %c0_8 = arith.constant 0 : index
    %8 = vector.load %arg4[%c0_7, %c0_8] : memref<8x1xf32, #tpu.memory_space<vmem>>, vector<8x1xf32>
    %9 = vector.broadcast %8 : vector<8x1xf32> to vector<8x50xf32>
    %10 = arith.mulf %7, %9 : vector<8x50xf32>
    %c0_9 = arith.constant 0 : index
    %c0_10 = arith.constant 0 : index
    %11 = vector.load %arg5[%c0_9, %c0_10] : memref<8x1xf32, #tpu.memory_space<vmem>>, vector<8x1xf32>
    %12 = vector.broadcast %11 : vector<8x1xf32> to vector<8x50xf32>
    %13 = arith.addf %10, %12 : vector<8x50xf32>
    %cst_11 = arith.constant 0.000000e+00 : f32
    %14 = vector.broadcast %cst_11 : f32 to vector<8x50xf32>
    %15 = arith.maximumf %13, %14 : vector<8x50xf32>
    %c0_12 = arith.constant 0 : index
    %c0_13 = arith.constant 0 : index
    %16 = vector.load %arg6[%c0_12, %c0_13] : memref<8x50xf32, #tpu.memory_space<vmem>>, vector<8x50xf32>
    %17 = arith.mulf %15, %16 : vector<8x50xf32>
    %18 = arith.truncf %17 : vector<8x50xf32> to vector<8x50xbf16>
    %c0_14 = arith.constant 0 : index
    %c0_15 = arith.constant 0 : index
    %c0_16 = arith.constant 0 : index
    %19 = vector.load %arg7[%c0_14, %c0_15, %c0_16] : memref<1x8x50xbf16, #tpu.memory_space<vmem>>, vector<1x8x50xbf16>
    %20 = vector.shape_cast %19 : vector<1x8x50xbf16> to vector<8x50xbf16>
    %21 = vector.shape_cast %18 : vector<8x50xbf16> to vector<1x8x50xbf16>
    tpu.vector_store %arg7[%c0_14, %c0_15, %c0_16], %21 {strides = array<i32>} : memref<1x8x50xbf16, #tpu.memory_space<vmem>>, vector<1x8x50xbf16>,
    return
  }
  func.func @transform_0(%arg0: i32) -> (i32, i32, i32) {
    %c0_i32 = arith.constant 0 : i32
    %c0_i32_0 = arith.constant 0 : i32
    %c0_i32_1 = arith.constant 0 : i32
    return %arg0, %c0_i32, %c0_i32_0 : i32, i32, i32
  }
  func.func @transform_1(%arg0: i32) -> (i32, i32) {
    %c0_i32 = arith.constant 0 : i32
    %c0_i32_0 = arith.constant 0 : i32
    %c0_i32_1 = arith.constant 0 : i32
    return %c0_i32, %c0_i32_0 : i32, i32
  }
  func.func @transform_2(%arg0: i32) -> (i32, i32) {
    %c0_i32 = arith.constant 0 : i32
    %c0_i32_0 = arith.constant 0 : i32
    %c0_i32_1 = arith.constant 0 : i32
    return %c0_i32, %c0_i32_0 : i32, i32
  }
  func.func @transform_3(%arg0: i32) -> (i32, i32) {
    %c0_i32 = arith.constant 0 : i32
    %c0_i32_0 = arith.constant 0 : i32
    %c0_i32_1 = arith.constant 0 : i32
    return %c0_i32, %c0_i32_0 : i32, i32
  }
  func.func @transform_4(%arg0: i32) -> (i32, i32) {
    %c0_i32 = arith.constant 0 : i32
    %c0_i32_0 = arith.constant 0 : i32
    %c0_i32_1 = arith.constant 0 : i32
    return %c0_i32, %c0_i32_0 : i32, i32
  }
  func.func @transform_5(%arg0: i32) -> (i32, i32) {
    %c0_i32 = arith.constant 0 : i32
    %c0_i32_0 = arith.constant 0 : i32
    %c0_i32_1 = arith.constant 0 : i32
    return %c0_i32, %c0_i32_0 : i32, i32
  }
  func.func @transform_6(%arg0: i32) -> (i32, i32, i32) {
    %c0_i32 = arith.constant 0 : i32
    %c0_i32_0 = arith.constant 0 : i32
    %c0_i32_1 = arith.constant 0 : i32
    return %arg0, %c0_i32, %c0_i32_0 : i32, i32, i32
  }
}

module attributes {stable_mosaic.version = 11 : i64} {
  func.func @upsample_kernel(%arg0: i32, %arg1: i32, %arg2: memref<1x8x50xbf16, #tpu.memory_space<vmem>>, %arg3: memref<50x128xbf16, #tpu.memory_space<vmem>>, %arg4: memref<1x8x128xf32, #tpu.memory_space<vmem>>) attributes {dimension_semantics = [#tpu.dimension_semantics<parallel>, #tpu.dimension_semantics<parallel>], iteration_bounds = array<i64: 2, 2>, scalar_prefetch = 0 : i64, scratch_operands = 0 : i64, tpu.core_type = #tpu.core_type<tc>, window_params = [{transform_indices = @transform_0, window_bounds = array<i64: 1, 8, 50>}, {transform_indices = @transform_1, window_bounds = array<i64: 50, 128>}, {transform_indices = @transform_2, window_bounds = array<i64: 1, 8, 128>}]} {
    %c0 = arith.constant 0 : index
    %c0_0 = arith.constant 0 : index
    %c0_1 = arith.constant 0 : index
    %0 = vector.load %arg2[%c0, %c0_0, %c0_1] : memref<1x8x50xbf16, #tpu.memory_space<vmem>>, vector<1x8x50xbf16>
    %1 = vector.shape_cast %0 : vector<1x8x50xbf16> to vector<8x50xbf16>
    %c0_2 = arith.constant 0 : index
    %c0_3 = arith.constant 0 : index
    %2 = vector.load %arg3[%c0_2, %c0_3] : memref<50x128xbf16, #tpu.memory_space<vmem>>, vector<50x128xbf16>
    %cst = arith.constant dense<0.000000e+00> : vector<8x128xf32>
    %3 = tpu.matmul %1, %2, %cst {dimension_numbers = #tpu.dot_dimension_numbers<[1], [0], [0], [1], [0, 0, 1, 1], [], []>} : vector<8x50xbf16>, vector<50x128xbf16>, vector<8x128xf32> -> vector<8x128xf32>
    %c0_4 = arith.constant 0 : index
    %c0_5 = arith.constant 0 : index
    %c0_6 = arith.constant 0 : index
    %4 = vector.load %arg4[%c0_4, %c0_5, %c0_6] : memref<1x8x128xf32, #tpu.memory_space<vmem>>, vector<1x8x128xf32>
    %5 = vector.shape_cast %4 : vector<1x8x128xf32> to vector<8x128xf32>
    %6 = vector.shape_cast %3 : vector<8x128xf32> to vector<1x8x128xf32>
    tpu.vector_store %arg4[%c0_4, %c0_5, %c0_6], %6 {strides = array<i32>} : memref<1x8x128xf32, #tpu.memory_space<vmem>>, vector<1x8x128xf32>,
    return
  }
  func.func @transform_0(%arg0: i32, %arg1: i32) -> (i32, i32, i32) {
    %c0_i32 = arith.constant 0 : i32
    %c0_i32_0 = arith.constant 0 : i32
    %c0_i32_1 = arith.constant 0 : i32
    return %arg0, %c0_i32, %c0_i32_0 : i32, i32, i32
  }
  func.func @transform_1(%arg0: i32, %arg1: i32) -> (i32, i32) {
    %c0_i32 = arith.constant 0 : i32
    %c0_i32_0 = arith.constant 0 : i32
    return %c0_i32, %arg1 : i32, i32
  }
  func.func @transform_2(%arg0: i32, %arg1: i32) -> (i32, i32, i32) {
    %c0_i32 = arith.constant 0 : i32
    %c0_i32_0 = arith.constant 0 : i32
    return %arg0, %c0_i32, %arg1 : i32, i32, i32
  }
}

</mosaic_0001>

<bundles_post_ra>
// kernel: ppm_forward.3
= control target key start
LH: loop header
LB: loop body
LE: loop exit
PB: predicated region body
PF: predicated region fallthrough
CT: control target
= control target key end

     0   :  { %s595_s9 = smov 0   ;;  %s597_s10 = smov 0   ;;  %s686_s0 = inlined_call_operand.vmem [shape: bf16[2,8,50], index: 0, kind: input, shape index: {}]   ;;  %s687_s1 = inlined_call_operand.vmem [shape: bf16[50,256], index: 1, kind: input, shape index: {}]   ;;  %s688_s2 = inlined_call_operand.vmem [shape: f32[2,8,256], index: 2, kind: output, shape index: {}]  }
   0x1   :  { %s599_s11 = smov 0   ;;  %s601_s12 = smov 0  }
   0x2   :  { %s603_s13 = smov 0   ;;  %s605_s14 = smov 0  }
   0x3   :  { %s607_s15 = smov 0  }
   0x4 LB: > { %s21_s16 = sadd.s32 1, %s568_s13  ;;  %s24_s17 = sadd.s32 1, %s572_s14  ;;  %s576_s15 = sphi %s607_s15, %s12_s15   ;;  %s572_s14 = sphi %s605_s14, %s694_s14   ;;  %s568_s13 = sphi %s603_s13, %s693_s13   ;;  %s564_s12 = sphi %s601_s12, %s692_s12   ;;  %s560_s11 = sphi %s599_s11, %s691_s11   ;;  %s556_s10 = sphi %s597_s10, %s690_s10   ;;  %s552_s9 = sphi %s595_s9, %s689_s9  }
   0x5   : > { %p22_p0 = scmp.ge.s32.totalorder %s21_s16, 2  ;;  %s57_s18 = sadd.s32 1, %s556_s10 }
   0x6   : > { %p64_p1 = scmp.ne.s32.totalorder %s556_s10, %s552_s9  ;;  %p65_p2 = scmp.eq.s32.totalorder %s576_s15, 0 }
   0x7   : > { %s696_s16 = smov (%p22_p0, %s21_s16), 0  ;;  %s698_s17 = smov (!%p22_p0, %s24_s17), %s572_s14 }
   0x8   : > { %s54_s19 = ssub.s32 %s568_s13, %s696_s16  ;;  %p66_p3 = por %p65_p2, %p64_p1 }
   0x9   : > { %p26_p4 = scmp.ge.s32.totalorder %s698_s17, 2  ;;  %p55_p5 = scmp.eq.s32.totalorder %s54_s19, 0 }
   0xa   : > { %p428_p6 = scmp.ge.s32.totalorder %s576_s15, 4 }
   0xb   : > { %s700_s17 = smov (%p26_p4, %s698_s17), 0 }
   0xc   : > { %s644_s20 = scalar_select %p55_p5, %s556_s10, %s57_s18  }
   0xd   : > { %118 = sbr.rel (%p428_p6) target bundleno = 27 (0x1b), region = 16 }
  0x12   : > { %128 = sbr.rel (!%p66_p3) target bundleno = 27 (0x1b), region = 24  ;;  %s130_s21 = sand.u32 (%p66_p3), 1, %s556_s10  }
  0x13   : > { %s429_s22 = sshll.u32 (%p66_p3), %s568_s13, 2  ;;  %s458_s23 = smul.u32 (%p66_p3), 28, %s130_s21 }
  0x14   : > { %s134_s26 = scalar_lea.vmem (%p66_p3), %s687_s1, %s429_s22 }
  0x15   : > { %v151_v0 = vld [vmem:[%s134_s26] sm:$0xf] (%p66_p3)  ;;  %v153_v1 = vld [vmem:[%s134_s26 + $0x8] sm:$0xf] (%p66_p3)  ;;  %v155_v2 = vld [vmem:[%s134_s26 + $0x10] sm:$0xf] (%p66_p3) }
  0x16   : > { %v157_v3 = vld [vmem:[%s134_s26 + $0x18] sm:$0xf] (%p66_p3)  ;;  %v159_v4 = vld [vmem:[%s134_s26 + $0x20] sm:$0xf] (%p66_p3)  ;;  %s132_s27 = scalar_lea.vmem (%p66_p3), [#allocation2], %s458_s23 }
  0x17   : > { %152 = vst [vmem:[%s132_s27] sm:$0xf] %v151_v0  ;;  %154 = vst [vmem:[%s132_s27 + $0x4] sm:$0xf] %v153_v1  ;;  %v161_v5 = vld [vmem:[%s134_s26 + $0x28] sm:$0xf] }
  0x18   : > { %156 = vst [vmem:[%s132_s27 + $0x8] sm:$0xf] %v155_v2  ;;  %158 = vst [vmem:[%s132_s27 + $0xc] sm:$0xf] %v157_v3  ;;  %v163_v6 = vld [vmem:[%s134_s26 + $0x30] sm:$0xf] }
  0x19   : > { %160 = vst [vmem:[%s132_s27 + $0x10] sm:$0xf] %v159_v4  ;;  %162 = vst [vmem:[%s132_s27 + $0x14] sm:$0xf] %v161_v5 }
  0x1a   : > { %164 = vst [vmem:[%s132_s27 + $0x18] sm:$0xf] %v163_v6 }
  0x1b PF: > { %p430_p7 = scmp.ge.s32.totalorder %s576_s15, 1  ;;  %p201_p8 = scmp.lt.s32.totalorder %s576_s15, 5 }
  0x1d   : > { %p202_p9 = pnand %p430_p7, %p201_p8 }
  0x1e   : > { %s208_s28 = sand.u32 (!%p202_p9), 1, %s552_s9   ;;  %p236_p10 = scmp.lt.s32.totalorder (!%p202_p9), %s564_s12, 1 }
  0x1f   : > { %205 = sbr.rel (%p202_p9) target bundleno = 252 (0xfc), region = 65  ;;  %p242_p11 = scmp.lt.s32.totalorder (!%p202_p9), %s560_s11, 1 }
  0x20   : > { %s459_s29 = smul.u32 (!%p202_p9), 28, %s208_s28 }
  0x22   : > { %s210_s30 = scalar_lea.vmem (!%p202_p9), [#allocation2], %s459_s29 }
  0x24   : > { %v578_v7 = vmov 0.0   ;;  %vm579_vm0 = vmmov 0   ;;  %vm282_vm1 = vcmask 1040384   ;;  %v518_v8 = vld [vmem:[%s210_s30 + $0x18] ss:$0 sps:$4 sm:$0x11]  }
  0x25   : > { %446 = vmatprep.subr.bf16.mxu0 %v578_v7  ;;  %454 = vmatprep.mubr.msk.bf16.mxu0 %vm579_vm0, %v578_v7  ;;  %v284_v9 = vsel %vm282_vm1, %v518_v8, 0  ;;  %v519_v10 = vld [vmem:[%s210_s30 + $0x10] sm:$0xff]   ;;  %s702_s12 = smov (!%p236_p10, %s564_s12), 1  ;;  %v520_v11 = vld [vmem:[%s210_s30 + $0x8] sm:$0xff]   ;;  %v521_v12 = vld [vmem:[%s210_s30] sm:$0xff]   ;;  %vm278_vm2 = vcmask 408576  }
  0x26   : > { %447 = vmatpush3.bf16.msra.mxu0 %v284_v9  ;;  %s431_s3 = sshll.u32 %s702_s12, 2  ;;  %s704_s11 = smov (!%p242_p11, %s560_s11), 1 }
  0x27   : > { %448 = vmatprep.subr.bf16.mxu0 %v578_v7  ;;  %s239_s6 = scalar_lea.vmem %s686_s0, %s431_s3  ;;  %s432_s7 = sshll.u32 %s702_s12, 1 }
  0x28   : > { %v249_v13 = vld [vmem:[%s239_s6] sm:$0xf]  ;;  %s245_s8 = sadd.s32 %s432_s7, %s704_s11 }
  0x29   : > { %s433_s9 = sshll.u32 %s245_s8, 3 }
  0x2a   : > { %449 = vmatpush3.bf16.msra.mxu0 %v519_v10  ;;  %s247_s21 = scalar_lea.vmem %s688_s2, %s433_s9 }
  0x2b   : > { %450 = vmatprep.subr.bf16.mxu0 %v578_v7 }
  0x2e   : > { %451 = vmatpush3.bf16.msra.mxu0 %v520_v11 }
  0x2f   : > { %452 = vmatprep.subr.bf16.mxu0 %v578_v7 }
  0x32   : > { %453 = vmatpush3.bf16.msra.mxu0 %v521_v12 }
  0x35   : > { %455 = vmatmul.mubr.msk.bf16.vlgmr.msra.gmra.mxu0 %vm278_vm2, %v249_v13 }
  0xf5   : > { %v320_v14 = vpop.f32.mrf.mxu0 }
  0xf6   : > { %326 = vst [vmem:[%s247_s21] sm:$0xff] %v320_v14 }
  0xf7   : > { %v456_v15 = vpop.f32.mrf.mxu0 }
  0xf9   : > { %v323_v16 = vpop.f32.mrf.mxu0 }
  0xfb   : > { %v457_v17 = vpop.f32.mrf.mxu0 }
  0xfc PF: > { %s12_s15 = sadd.s32 1, %s576_s15   ;;  %s689_s9 = smov %s556_s10 }
  0xfd   : > { %p9_p12 = scmp.ge.s32.totalorder %s12_s15, 6   ;;  %s690_s10 = smov %s644_s20 }
  0xfe   : > { %s691_s11 = smov %s568_s13  ;;  %s692_s12 = smov %s572_s14 }
  0xff   : > { %s693_s13 = smov %s696_s16  ;;  %s694_s14 = smov %s700_s17 }
 0x100   :  { %11 = sbr.rel (!%p9_p12) target bundleno = 4 (0x4), region = 107 }

// kernel: ppm_forward.2
= control target key start
LH: loop header
LB: loop body
LE: loop exit
PB: predicated region body
PF: predicated region fallthrough
CT: control target
= control target key end

     0   :  { %s678_s21 = smov 0   ;;  %s759_s0 = inlined_call_operand.vmem [shape: f32[2,8,256], index: 0, kind: input, shape index: {}]   ;;  %s760_s1 = inlined_call_operand.vmem [shape: bf16[256,50], index: 1, kind: input, shape index: {}]   ;;  %s761_s2 = inlined_call_operand.vmem [shape: bf16[8,8], index: 2, kind: input, shape index: {}]   ;;  %s762_s3 = inlined_call_operand.vmem [shape: f32[8,1], index: 3, kind: input, shape index: {}]   ;;  %s763_s4 = inlined_call_operand.vmem [shape: f32[8,1], index: 4, kind: input, shape index: {}]   ;;  %s764_s5 = inlined_call_operand.vmem [shape: f32[8,50], index: 5, kind: input, shape index: {}]   ;;  %s765_s6 = inlined_call_operand.vmem [shape: bf16[2,8,50], index: 6, kind: output, shape index: {}]  }
   0x1 LB: > { %s546_s22 = sadd.s32 4294967295, %s638_s21   ;;  %p550_p0 = scmp.ge.s32.totalorder %s638_s21, 1  ;;  %s638_s21 = sphi %s678_s21, %s16_s21  }
   0x2   : > { %p212_p1 = scmp.lt.s32.totalorder %s638_s21, 3 }
   0x4   : > { %p213_p2 = pnand %p550_p0, %p212_p1 }
   0x5   : > { %p241_p3 = scmp.lt.s32.totalorder (!%p213_p2), %s546_s22, 1 }
   0x6   : > { %216 = sbr.rel (%p213_p2) target bundleno = 451 (0x1c3), region = 44 }
   0xb   : > { %v616_v0 = vld [vmem:[%s760_s1 + $0x78] sm:$0xff]   ;;  %v618_v2 = vld [vmem:[%s760_s1 + $0x70] sm:$0xff]   ;;  %v620_v4 = vld [vmem:[%s760_s1 + $0x68] sm:$0xff]   ;;  %s767_s22 = smov (!%p241_p3, %s546_s22), 1  ;;  %v640_v20 = vmov 0.0   ;;  %vm641_vm0 = vmmov 0  }
   0xc   : > { %v617_v1 = vld [vmem:[%s760_s1 + $0x38] sm:$0xff]   ;;  %574 = vmatprep.subr.bf16.mxu0 %v616_v0  ;;  %v619_v3 = vld [vmem:[%s760_s1 + $0x30] sm:$0xff]   ;;  %v621_v5 = vld [vmem:[%s760_s1 + $0x28] sm:$0xff]   ;;  %s573_s13 = sshll.u32 %s767_s22, 4  ;;  %598 = vmatprep.subr.bf16.mxu1 %v640_v20  ;;  %v642_v22 = vmov 0   ;;  %vm429_vm1 = vcmask 1043456  }
   0xd   : > { %575 = vmatpush3.bf16.msra.mxu0 %v617_v1  ;;  %v622_v6 = vld [vmem:[%s760_s1 + $0x60] sm:$0xff]   ;;  %v624_v8 = vld [vmem:[%s760_s1 + $0x58] sm:$0xff]   ;;  %s245_s20 = scalar_lea.vmem %s759_s0, %s573_s13  ;;  %v626_v10 = vld [vmem:[%s760_s1 + $0x50] sm:$0xff]   ;;  %600 = vmatprep.mubr.msk.bf16.mxu1 %vm641_vm0, %v640_v20  ;;  %vm425_vm2 = vcmask 64512   ;;  %s553_s23 = sshll.u32 %s767_s22, 2  ;;  %vm491_vm3 = vcmask 404480  }
   0xe   : > { %576 = vmatprep.subr.bf16.mxu0 %v618_v2  ;;  %v623_v7 = vld [vmem:[%s760_s1 + $0x20] sm:$0xff]   ;;  %v625_v9 = vld [vmem:[%s760_s1 + $0x18] sm:$0xff]   ;;  %v252_v11 = vld [vmem:[%s245_s20 + $0x8] sm:$0xff]  ;;  %615 = vset.pattern.permute.xlu0 %v642_v22  ;;  %s249_s26 = scalar_lea.vmem %s765_s6, %s553_s23 }
   0xf   : > { %v254_v12 = vpack.c.bf16 %v252_v11, %v252_v11  ;;  %v627_v13 = vld [vmem:[%s760_s1 + $0x10] sm:$0xff]   ;;  %v628_v14 = vld [vmem:[%s760_s1 + $0x48] sm:$0xff]   ;;  %v630_v16 = vld [vmem:[%s760_s1 + $0x40] sm:$0xff]  }
  0x10   : > { %v629_v15 = vld [vmem:[%s760_s1 + $0x8] sm:$0xff]   ;;  %v631_v17 = vld [vmem:[%s760_s1] sm:$0xff]  }
  0x11   : > { %577 = vmatpush3.bf16.msra.mxu0 %v619_v3  ;;  %415 = vmatprep.mubr.bf16.mxu0 %v254_v12  ;;  %v251_v18 = vld [vmem:[%s245_s20] sm:$0xff] }
  0x12   : > { %578 = vmatprep.subr.bf16.mxu0 %v620_v4  ;;  %v253_v19 = vpack.c.bf16 %v251_v18, %v251_v18  ;;  %v473_v21 = vld [vmem:[%s762_s3] sm:$0xff] }
  0x13   : > { %476 = vperm.xlu0 %615, %v473_v21   ;;  %v480_v23 = vld [vmem:[%s763_s4] sm:$0xff] }
  0x14   : > { %v423_v31 = vld [vmem:[%s761_s2] sm:$0xf] }
  0x15   : > { %579 = vmatpush3.bf16.msra.mxu0 %v621_v5  ;;  %v488_v38 = vld [vmem:[%s764_s5] sm:$0xff] }
  0x16   : > { %580 = vmatprep.subr.bf16.mxu0 %v622_v6 }
  0x17   : > { %483 = vperm.xlu0 %615, %v480_v23  }
  0x19   : > { %581 = vmatpush3.bf16.msra.mxu0 %v623_v7 }
  0x1a   : > { %582 = vmatprep.subr.bf16.mxu0 %v624_v8 }
  0x1d   : > { %583 = vmatpush3.bf16.msra.mxu0 %v625_v9 }
  0x1e   : > { %584 = vmatprep.subr.bf16.mxu0 %v626_v10 }
  0x21   : > { %585 = vmatpush3.bf16.msra.mxu0 %v627_v13 }
  0x22   : > { %586 = vmatprep.subr.bf16.mxu0 %v628_v14 }
  0x25   : > { %587 = vmatpush3.bf16.msra.mxu0 %v629_v15 }
  0x26   : > { %588 = vmatprep.subr.bf16.mxu0 %v630_v16 }
  0x29   : > { %589 = vmatpush3.bf16.msra.mxu0 %v631_v17 }
  0x2c   : > { %416 = vmatmul.mubr.bf16.vlgmr.msra.gmra.mxu0 %v253_v19 }
  0x8e   : > { %v477_v32 = vpop.permute.xlu0 %476 }
  0x92   : > { %v484_v35 = vpop.permute.xlu0 %483 }
  0xec   : > { %v590_v24 = vpop.f32.mrf.mxu0 }
  0xee   : > { %v591_v25 = vpop.f32.mrf.mxu0 }
  0xef   : > { %v592_v26 = vadd.f32 %v591_v25, %v590_v24 }
  0xf0   : > { %v593_v27 = vpop.f32.mrf.mxu0 }
  0xf1   : > { %v424_v28 = vpack.c.bf16 %v592_v26, %v592_v26 }
  0xf2   : > { %v594_v29 = vpop.f32.mrf.mxu0 }
  0xf3   : > { %v431_v30 = vsel %vm429_vm1, %v424_v28, 0 }
  0xf4   : > { %599 = vmatpush3.bf16.msra.mxu1 %v431_v30 }
  0xf7   : > { %601 = vmatmul.mubr.msk.bf16.vlgmr.msra.gmra.mxu1 %vm425_vm2, %v423_v31 }
 0x1b7   : > { %v467_v33 = vpop.f32.mrf.mxu1 }
 0x1b8   : > { %v479_v34 = vmul.f32 %v477_v32, %v467_v33 }
 0x1b9   : > { %v602_v36 = vpop.f32.mrf.mxu1 }
 0x1ba   : > { %v486_v37 = vadd.f32 %v484_v35, %v479_v34 }
 0x1bb   : > { %v470_v39 = vpop.f32.mrf.mxu1 }
 0x1bc   : > { %v487_v40 = vmax.f32 %v486_v37, 0.0 }
 0x1bd   : > { %v603_v41 = vpop.f32.mrf.mxu1 }
 0x1be   : > { %v489_v42 = vmul.f32 %v488_v38, %v487_v40 }
 0x1c0   : > { %v490_v43 = vpack.c.bf16 %v489_v42, %v489_v42 }
 0x1c2   : > { %492 = vst.msk [vmem:[%s249_s26] sm:$0xf] %vm491_vm3, %v490_v43 }
 0x1c3 PF: > { %s16_s21 = sadd.s32 1, %s638_s21  }
 0x1c4   : > { %p13_p4 = scmp.ge.s32.totalorder %s16_s21, 4  }
 0x1c6   :  { %15 = sbr.rel (!%p13_p4) target bundleno = 1 (0x1), region = 74 }

</bundles_post_ra>
